<compile_context>
chip_gen: v5e
topology: v5e:2x2
jax: 0.10.0
libtpu: 0.0.40
codegen_flags: <defaults>
</compile_context>

<pallas_src>
import jax
import jax.numpy as jnp
from jax.experimental import pallas as pl
from jax.experimental.pallas import tpu as pltpu

_QBOUND = 127.0   # symmetric 8-bit fake quant
_PACK = 8         # batch rows packed per vreg row (16 features * 8 = 128 lanes)


# ----------------------------------------------------------------------------
# Host-side one-time prep (NOT in the per-call forward path)
# ----------------------------------------------------------------------------
def calibrate_act_amax(x, params):
    """Float calibration pass -> per-tensor amax of the three quantizer inputs.
    Stand-in for the calibrated amax the torch test loads from checkpoint."""
    (w1, b1), (w2, b2), (w3, b3) = params
    a0 = jnp.max(jnp.abs(x))
    h1 = jnp.maximum(x @ w1.T + b1, 0.0)
    a1 = jnp.max(jnp.abs(h1))
    h2 = jnp.maximum(h1 @ w2.T + b2, 0.0)
    a2 = jnp.max(jnp.abs(h2))
    return jnp.stack([a0, a1, a2])


def _quantize_weight_int(w):
    """Per-output-channel (axis 0) symmetric 8-bit quant of [out, in] weight.
    Returns integer-valued weights (f32) and per-channel dequant scale."""
    amax = jnp.maximum(jnp.max(jnp.abs(w), axis=1, keepdims=True), 1e-12)
    w_int = jnp.clip(jnp.round(w * (_QBOUND / amax)), -_QBOUND, _QBOUND)
    return w_int, (amax / _QBOUND).reshape(-1)          # (out, in), (out,)


def _prep_layer(w, b, act_inv_in, next_scale):
    """Lane-packed (block-diagonal) bf16 integer weight + fused per-column
    output scale / bias for one QuantLinear layer.

      w: [out, in], b: [1, out]
      act_inv_in: scalar amax_in/127 (input activation dequant scale)
      next_scale: scalar 127/amax_next folded into this layer's output
                  (1.0 for the last layer)
    """
    w_int, w_inv = _quantize_weight_int(w)
    w_blk = jnp.kron(jnp.eye(_PACK, dtype=w_int.dtype), w_int.T)   # (P*in, P*out)
    col_scale = jnp.tile(w_inv, _PACK) * act_inv_in * next_scale   # (P*out,)
    col_bias = jnp.tile(b.reshape(-1), _PACK) * next_scale         # (P*out,)
    return (w_blk.astype(jnp.bfloat16),
            col_scale.reshape(1, -1).astype(jnp.float32),
            col_bias.reshape(1, -1).astype(jnp.float32))


def prepare_model(params, act_amax):
    """One-time prep: weight fake-quant, 8-way block-diagonal lane packing,
    activation-scale folding.  Returns the arrays the kernel consumes."""
    (w1, b1), (w2, b2), (w3, b3) = params
    a = jnp.maximum(act_amax.astype(jnp.float32), 1e-12)
    s = _QBOUND / a        # quant scales (127/amax)
    inv = a / _QBOUND      # dequant scales (amax/127)
    l1 = _prep_layer(w1, b1, inv[0], s[1])
    l2 = _prep_layer(w2, b2, inv[1], s[2])
    l3 = _prep_layer(w3, b3, inv[2], jnp.float32(1.0))
    s0 = jnp.reshape(s[0], (1,)).astype(jnp.float32)
    return (s0, *l1, *l2, *l3)


# ----------------------------------------------------------------------------
# Kernel
# ----------------------------------------------------------------------------
def mymodel_kernel(
    s0_ref,                      # SMEM (1,) f32: 127/amax_x
    x_ref,                       # VMEM (TM, 128) f32 (8 packed rows / vreg row)
    w1_ref, sc1_ref, bi1_ref,    # (128,256) bf16, (1,256) f32, (1,256) f32
    w2_ref, sc2_ref, bi2_ref,    # (256,512) bf16, (1,512) f32, (1,512) f32
    w3_ref, sc3_ref, bi3_ref,    # (512,128) bf16, (1,128) f32, (1,128) f32
    o_ref,                       # VMEM (TM, 128) f32
):
    # Layer 1: quantize input, integer bf16 MXU matmul, fused scale+bias, ReLU.
    q = jnp.clip(jnp.round(x_ref[...] * s0_ref[0]), -_QBOUND, _QBOUND)
    q = q.astype(jnp.bfloat16)
    d = jnp.dot(q, w1_ref[...], preferred_element_type=jnp.float32)
    a = jnp.maximum(d * sc1_ref[...] + bi1_ref[...], 0.0)   # == h1 * (127/amax_h1)

    # Layer 2: input already carries the next quant scale -> just round+clip.
    q = jnp.clip(jnp.round(a), -_QBOUND, _QBOUND).astype(jnp.bfloat16)
    d = jnp.dot(q, w2_ref[...], preferred_element_type=jnp.float32)
    a = jnp.maximum(d * sc2_ref[...] + bi2_ref[...], 0.0)   # == h2 * (127/amax_h2)

    # Layer 3: no ReLU, no further quantizer -> plain dequant scale + bias.
    q = jnp.clip(jnp.round(a), -_QBOUND, _QBOUND).astype(jnp.bfloat16)
    d = jnp.dot(q, w3_ref[...], preferred_element_type=jnp.float32)
    o_ref[...] = (d * sc3_ref[...] + bi3_ref[...]).astype(o_ref.dtype)


# ----------------------------------------------------------------------------
# Wrapper
# ----------------------------------------------------------------------------
def mymodel_forward(x, prepared):
    """x: [N, 16] float32 -> [N, 16] float32."""
    N, F = x.shape
    assert F == 16, F
    s0, rest = prepared[0], prepared[1:]

    # Pad N to a multiple of _PACK*8 so packed rows tile cleanly at (8, 128).
    pad_to = _PACK * 8
    n_pad = (-N) % pad_to
    if n_pad:
        x = jnp.pad(x, ((0, n_pad), (0, 0)))
    npad = N + n_pad
    np_rows = npad // _PACK
    xp = x.reshape(np_rows, _PACK * F)      # (Np, 128): rows contiguous -> free

    # Packed row tile: large (amortizes ~0.35us/step), >=2 grid steps when
    # possible (v7x has 2 TensorCores), sublane-aligned (multiple of 8).
    tm = min(512, ((pl.cdiv(np_rows, 2) + 7) // 8) * 8)
    tm = max(8, min(tm, np_rows))
    grid = (pl.cdiv(np_rows, tm),)

    def resident(shape):
        # Same block every step -> stays VMEM-resident (never re-DMA'd).
        return pl.BlockSpec(shape, lambda i: (0, 0))

    out_p = pl.pallas_call(
        mymodel_kernel,
        out_shape=jax.ShapeDtypeStruct((np_rows, _PACK * F), jnp.float32),
        grid=grid,
        in_specs=[
            pl.BlockSpec(memory_space=pltpu.MemorySpace.SMEM),        # s0
            pl.BlockSpec((tm, _PACK * F), lambda i: (i, 0)),          # x tile
            resident((_PACK * 16, _PACK * 32)),                       # W1'
            resident((1, _PACK * 32)), resident((1, _PACK * 32)),     # sc1, b1
            resident((_PACK * 32, _PACK * 64)),                       # W2'
            resident((1, _PACK * 64)), resident((1, _PACK * 64)),     # sc2, b2
            resident((_PACK * 64, _PACK * 16)),                       # W3'
            resident((1, _PACK * 16)), resident((1, _PACK * 16)),     # sc3, b3
        ],
        out_specs=pl.BlockSpec((tm, _PACK * F), lambda i: (i, 0)),
        compiler_params=pltpu.CompilerParams(
            dimension_semantics=("parallel",),
        ),
    )(s0, xp, *rest)

    out = out_p.reshape(npad, F)
    return out[:N] if n_pad else out


# ----------------------------------------------------------------------------
# Pure-JAX reference (canonical fake-quant semantics of the torch module)
# ----------------------------------------------------------------------------
def _fq(v, amax):
    amax = jnp.maximum(amax, 1e-12)
    return jnp.clip(jnp.round(v * (_QBOUND / amax)), -_QBOUND, _QBOUND) * (
        amax / _QBOUND)


def reference_forward(x, params, act_amax):
    def qlinear(h, w, b, a_act):
        w_amax = jnp.max(jnp.abs(w), axis=1, keepdims=True)
        return _fq(h, a_act) @ _fq(w, w_amax).T + b

    (w1, b1), (w2, b2), (w3, b3) = params
    h = jnp.maximum(qlinear(x, w1, b1, act_amax[0]), 0.0)
    h = jnp.maximum(qlinear(h, w2, b2, act_amax[1]), 0.0)
    return qlinear(h, w3, b3, act_amax[2])


def init_params(key):
    """Deterministic parameter init mirroring nn.Linear shapes."""

    def linear_init(k, fan_in, fan_out):
        kw, kb = jax.random.split(k)
        bound = 1.0 / jnp.sqrt(fan_in)
        w = jax.random.uniform(kw, (fan_out, fan_in), jnp.float32, -bound, bound)
        b = jax.random.uniform(kb, (1, fan_out), jnp.float32, -bound, bound)
        return w, b

    k1, k2, k3 = jax.random.split(key, 3)
    return (
        linear_init(k1, 16, 32),
        linear_init(k2, 32, 64),
        linear_init(k3, 64, 16),
    )


if __name__ == "__main__":
    key = jax.random.PRNGKey(0)
    kx, kp = jax.random.split(key)

    N = 8
    x = jax.random.normal(kx, (N, 16), dtype=jnp.float32)
    params = init_params(kp)

    # One-time calibration + prep (stand-in for checkpoint-loaded amax);
    # deliberately OUTSIDE the per-call forward path.
    act_amax = calibrate_act_amax(x, params)
    prepared = prepare_model(params, act_amax)

    out = jax.block_until_ready(mymodel_forward(x, prepared))
    ref = reference_forward(x, params, act_amax)

    assert out.shape == (N, 16), out.shape
    # Integer dots are exact; tolerance covers f32 scale reassociation (a rare
    # round() flip at a .5 boundary changes a value by ~amax/127 locally).
    assert jnp.allclose(out, ref, atol=1e-2, rtol=1e-2), float(
        jnp.max(jnp.abs(out - ref)))

    print("KERNEL_OK")
</pallas_src>

<mosaic_0001>
module attributes {stable_mosaic.version = 11 : i64} {
  func.func @mymodel_kernel(%arg0: i32, %arg1: memref<1xf32, #tpu.memory_space<smem>>, %arg2: memref<8x128xf32, #tpu.memory_space<vmem>>, %arg3: memref<128x256xbf16, #tpu.memory_space<vmem>>, %arg4: memref<1x256xf32, #tpu.memory_space<vmem>>, %arg5: memref<1x256xf32, #tpu.memory_space<vmem>>, %arg6: memref<256x512xbf16, #tpu.memory_space<vmem>>, %arg7: memref<1x512xf32, #tpu.memory_space<vmem>>, %arg8: memref<1x512xf32, #tpu.memory_space<vmem>>, %arg9: memref<512x128xbf16, #tpu.memory_space<vmem>>, %arg10: memref<1x128xf32, #tpu.memory_space<vmem>>, %arg11: memref<1x128xf32, #tpu.memory_space<vmem>>, %arg12: memref<8x128xf32, #tpu.memory_space<vmem>>) attributes {dimension_semantics = [#tpu.dimension_semantics<parallel>], iteration_bounds = array<i64: 1>, scalar_prefetch = 0 : i64, scratch_operands = 0 : i64, tpu.core_type = #tpu.core_type<tc>, window_params = [{transform_indices = @transform_0, window_bounds = array<i64: 1>}, {transform_indices = @transform_1, window_bounds = array<i64: 8, 128>}, {pipeline_mode = #tpu.pipeline_mode<synchronous>, transform_indices = @transform_2, window_bounds = array<i64: 128, 256>}, {pipeline_mode = #tpu.pipeline_mode<synchronous>, transform_indices = @transform_3, window_bounds = array<i64: 1, 256>}, {pipeline_mode = #tpu.pipeline_mode<synchronous>, transform_indices = @transform_4, window_bounds = array<i64: 1, 256>}, {pipeline_mode = #tpu.pipeline_mode<synchronous>, transform_indices = @transform_5, window_bounds = array<i64: 256, 512>}, {pipeline_mode = #tpu.pipeline_mode<synchronous>, transform_indices = @transform_6, window_bounds = array<i64: 1, 512>}, {pipeline_mode = #tpu.pipeline_mode<synchronous>, transform_indices = @transform_7, window_bounds = array<i64: 1, 512>}, {pipeline_mode = #tpu.pipeline_mode<synchronous>, transform_indices = @transform_8, window_bounds = array<i64: 512, 128>}, {pipeline_mode = #tpu.pipeline_mode<synchronous>, transform_indices = @transform_9, window_bounds = array<i64: 1, 128>}, {pipeline_mode = #tpu.pipeline_mode<synchronous>, transform_indices = @transform_10, window_bounds = array<i64: 1, 128>}, {transform_indices = @transform_11, window_bounds = array<i64: 8, 128>}]} {
    %c0 = arith.constant 0 : index
    %c0_0 = arith.constant 0 : index
    %0 = vector.load %arg2[%c0, %c0_0] : memref<8x128xf32, #tpu.memory_space<vmem>>, vector<8x128xf32>
    %c0_1 = arith.constant 0 : index
    %1 = memref.load %arg1[%c0_1] : memref<1xf32, #tpu.memory_space<smem>>
    %2 = vector.broadcast %1 : f32 to vector<8x128xf32>
    %3 = arith.mulf %0, %2 : vector<8x128xf32>
    %4 = math.roundeven %3 : vector<8x128xf32>
    %cst = arith.constant -1.270000e+02 : f32
    %cst_2 = arith.constant 1.270000e+02 : f32
    %5 = vector.broadcast %cst : f32 to vector<8x128xf32>
    %6 = arith.maximumf %5, %4 : vector<8x128xf32>
    %7 = vector.broadcast %cst_2 : f32 to vector<8x128xf32>
    %8 = arith.minimumf %7, %6 : vector<8x128xf32>
    %9 = arith.truncf %8 : vector<8x128xf32> to vector<8x128xbf16>
    %c0_3 = arith.constant 0 : index
    %c0_4 = arith.constant 0 : index
    %10 = vector.load %arg3[%c0_3, %c0_4] : memref<128x256xbf16, #tpu.memory_space<vmem>>, vector<128x256xbf16>
    %cst_5 = arith.constant dense<0.000000e+00> : vector<8x256xf32>
    %11 = tpu.matmul %9, %10, %cst_5 {dimension_numbers = #tpu.dot_dimension_numbers<[1], [0], [0], [1], [0, 0, 1, 1], [], []>} : vector<8x128xbf16>, vector<128x256xbf16>, vector<8x256xf32> -> vector<8x256xf32>
    %c0_6 = arith.constant 0 : index
    %c0_7 = arith.constant 0 : index
    %12 = vector.load %arg4[%c0_6, %c0_7] : memref<1x256xf32, #tpu.memory_space<vmem>>, vector<1x256xf32>
    %13 = vector.broadcast %12 : vector<1x256xf32> to vector<8x256xf32>
    %14 = arith.mulf %11, %13 : vector<8x256xf32>
    %c0_8 = arith.constant 0 : index
    %c0_9 = arith.constant 0 : index
    %15 = vector.load %arg5[%c0_8, %c0_9] : memref<1x256xf32, #tpu.memory_space<vmem>>, vector<1x256xf32>
    %16 = vector.broadcast %15 : vector<1x256xf32> to vector<8x256xf32>
    %17 = arith.addf %14, %16 : vector<8x256xf32>
    %cst_10 = arith.constant 0.000000e+00 : f32
    %18 = vector.broadcast %cst_10 : f32 to vector<8x256xf32>
    %19 = arith.maximumf %17, %18 : vector<8x256xf32>
    %20 = math.roundeven %19 : vector<8x256xf32>
    %cst_11 = arith.constant -1.270000e+02 : f32
    %cst_12 = arith.constant 1.270000e+02 : f32
    %21 = vector.broadcast %cst_11 : f32 to vector<8x256xf32>
    %22 = arith.maximumf %21, %20 : vector<8x256xf32>
    %23 = vector.broadcast %cst_12 : f32 to vector<8x256xf32>
    %24 = arith.minimumf %23, %22 : vector<8x256xf32>
    %25 = arith.truncf %24 : vector<8x256xf32> to vector<8x256xbf16>
    %c0_13 = arith.constant 0 : index
    %c0_14 = arith.constant 0 : index
    %26 = vector.load %arg6[%c0_13, %c0_14] : memref<256x512xbf16, #tpu.memory_space<vmem>>, vector<256x512xbf16>
    %cst_15 = arith.constant dense<0.000000e+00> : vector<8x512xf32>
    %27 = tpu.matmul %25, %26, %cst_15 {dimension_numbers = #tpu.dot_dimension_numbers<[1], [0], [0], [1], [0, 0, 1, 1], [], []>} : vector<8x256xbf16>, vector<256x512xbf16>, vector<8x512xf32> -> vector<8x512xf32>
    %c0_16 = arith.constant 0 : index
    %c0_17 = arith.constant 0 : index
    %28 = vector.load %arg7[%c0_16, %c0_17] : memref<1x512xf32, #tpu.memory_space<vmem>>, vector<1x512xf32>
    %29 = vector.broadcast %28 : vector<1x512xf32> to vector<8x512xf32>
    %30 = arith.mulf %27, %29 : vector<8x512xf32>
    %c0_18 = arith.constant 0 : index
    %c0_19 = arith.constant 0 : index
    %31 = vector.load %arg8[%c0_18, %c0_19] : memref<1x512xf32, #tpu.memory_space<vmem>>, vector<1x512xf32>
    %32 = vector.broadcast %31 : vector<1x512xf32> to vector<8x512xf32>
    %33 = arith.addf %30, %32 : vector<8x512xf32>
    %cst_20 = arith.constant 0.000000e+00 : f32
    %34 = vector.broadcast %cst_20 : f32 to vector<8x512xf32>
    %35 = arith.maximumf %33, %34 : vector<8x512xf32>
    %36 = math.roundeven %35 : vector<8x512xf32>
    %cst_21 = arith.constant -1.270000e+02 : f32
    %cst_22 = arith.constant 1.270000e+02 : f32
    %37 = vector.broadcast %cst_21 : f32 to vector<8x512xf32>
    %38 = arith.maximumf %37, %36 : vector<8x512xf32>
    %39 = vector.broadcast %cst_22 : f32 to vector<8x512xf32>
    %40 = arith.minimumf %39, %38 : vector<8x512xf32>
    %41 = arith.truncf %40 : vector<8x512xf32> to vector<8x512xbf16>
    %c0_23 = arith.constant 0 : index
    %c0_24 = arith.constant 0 : index
    %42 = vector.load %arg9[%c0_23, %c0_24] : memref<512x128xbf16, #tpu.memory_space<vmem>>, vector<512x128xbf16>
    %cst_25 = arith.constant dense<0.000000e+00> : vector<8x128xf32>
    %43 = tpu.matmul %41, %42, %cst_25 {dimension_numbers = #tpu.dot_dimension_numbers<[1], [0], [0], [1], [0, 0, 1, 1], [], []>} : vector<8x512xbf16>, vector<512x128xbf16>, vector<8x128xf32> -> vector<8x128xf32>
    %c0_26 = arith.constant 0 : index
    %c0_27 = arith.constant 0 : index
    %44 = vector.load %arg10[%c0_26, %c0_27] : memref<1x128xf32, #tpu.memory_space<vmem>>, vector<1x128xf32>
    %45 = vector.broadcast %44 : vector<1x128xf32> to vector<8x128xf32>
    %46 = arith.mulf %43, %45 : vector<8x128xf32>
    %c0_28 = arith.constant 0 : index
    %c0_29 = arith.constant 0 : index
    %47 = vector.load %arg11[%c0_28, %c0_29] : memref<1x128xf32, #tpu.memory_space<vmem>>, vector<1x128xf32>
    %48 = vector.broadcast %47 : vector<1x128xf32> to vector<8x128xf32>
    %49 = arith.addf %46, %48 : vector<8x128xf32>
    %c0_30 = arith.constant 0 : index
    %c0_31 = arith.constant 0 : index
    %50 = vector.load %arg12[%c0_30, %c0_31] : memref<8x128xf32, #tpu.memory_space<vmem>>, vector<8x128xf32>
    tpu.vector_store %arg12[%c0_30, %c0_31], %49 {strides = array<i32>} : memref<8x128xf32, #tpu.memory_space<vmem>>, vector<8x128xf32>,
    return
  }
  func.func @transform_0(%arg0: i32) -> i32 {
    %c0_i32 = arith.constant 0 : i32
    %c0_i32_0 = arith.constant 0 : i32
    return %c0_i32 : i32
  }
  func.func @transform_1(%arg0: i32) -> (i32, i32) {
    %c0_i32 = arith.constant 0 : i32
    %c0_i32_0 = arith.constant 0 : i32
    return %arg0, %c0_i32 : i32, i32
  }
  func.func @transform_2(%arg0: i32) -> (i32, i32) {
    %c0_i32 = arith.constant 0 : i32
    %c0_i32_0 = arith.constant 0 : i32
    %c0_i32_1 = arith.constant 0 : i32
    return %c0_i32, %c0_i32_0 : i32, i32
  }
  func.func @transform_3(%arg0: i32) -> (i32, i32) {
    %c0_i32 = arith.constant 0 : i32
    %c0_i32_0 = arith.constant 0 : i32
    %c0_i32_1 = arith.constant 0 : i32
    return %c0_i32, %c0_i32_0 : i32, i32
  }
  func.func @transform_4(%arg0: i32) -> (i32, i32) {
    %c0_i32 = arith.constant 0 : i32
    %c0_i32_0 = arith.constant 0 : i32
    %c0_i32_1 = arith.constant 0 : i32
    return %c0_i32, %c0_i32_0 : i32, i32
  }
  func.func @transform_5(%arg0: i32) -> (i32, i32) {
    %c0_i32 = arith.constant 0 : i32
    %c0_i32_0 = arith.constant 0 : i32
    %c0_i32_1 = arith.constant 0 : i32
    return %c0_i32, %c0_i32_0 : i32, i32
  }
  func.func @transform_6(%arg0: i32) -> (i32, i32) {
    %c0_i32 = arith.constant 0 : i32
    %c0_i32_0 = arith.constant 0 : i32
    %c0_i32_1 = arith.constant 0 : i32
    return %c0_i32, %c0_i32_0 : i32, i32
  }
  func.func @transform_7(%arg0: i32) -> (i32, i32) {
    %c0_i32 = arith.constant 0 : i32
    %c0_i32_0 = arith.constant 0 : i32
    %c0_i32_1 = arith.constant 0 : i32
    return %c0_i32, %c0_i32_0 : i32, i32
  }
  func.func @transform_8(%arg0: i32) -> (i32, i32) {
    %c0_i32 = arith.constant 0 : i32
    %c0_i32_0 = arith.constant 0 : i32
    %c0_i32_1 = arith.constant 0 : i32
    return %c0_i32, %c0_i32_0 : i32, i32
  }
  func.func @transform_9(%arg0: i32) -> (i32, i32) {
    %c0_i32 = arith.constant 0 : i32
    %c0_i32_0 = arith.constant 0 : i32
    %c0_i32_1 = arith.constant 0 : i32
    return %c0_i32, %c0_i32_0 : i32, i32
  }
  func.func @transform_10(%arg0: i32) -> (i32, i32) {
    %c0_i32 = arith.constant 0 : i32
    %c0_i32_0 = arith.constant 0 : i32
    %c0_i32_1 = arith.constant 0 : i32
    return %c0_i32, %c0_i32_0 : i32, i32
  }
  func.func @transform_11(%arg0: i32) -> (i32, i32) {
    %c0_i32 = arith.constant 0 : i32
    %c0_i32_0 = arith.constant 0 : i32
    return %arg0, %c0_i32 : i32, i32
  }
}

</mosaic_0001>

<bundles_post_ra>
// kernel: tpu_custom_call.1
= control target key start
LH: loop header
LB: loop body
LE: loop exit
PB: predicated region body
PF: predicated region fallthrough
CT: control target
= control target key end

     0   :  { %17 = vsyncpa [#allocation4], 0  ;;  %s2108_s0 = inlined_call_operand.<no memory space> [shape: f32[1], index: 0, kind: input, shape index: {}]   ;;  %s2109_s1 = inlined_call_operand.hbm [shape: f32[8,128], index: 1, kind: input, shape index: {}]   ;;  %s2110_s2 = inlined_call_operand.hbm [shape: bf16[128,256], index: 2, kind: input, shape index: {}]   ;;  %s2111_s3 = inlined_call_operand.vmem [shape: f32[1,256], index: 3, kind: input, shape index: {}]   ;;  %s2112_s4 = inlined_call_operand.hbm [shape: f32[1,256], index: 4, kind: input, shape index: {}]   ;;  %s2113_s5 = inlined_call_operand.hbm [shape: bf16[256,512], index: 5, kind: input, shape index: {}]   ;;  %s2114_s6 = inlined_call_operand.vmem [shape: f32[1,512], index: 6, kind: input, shape index: {}]   ;;  %s2115_s7 = inlined_call_operand.hbm [shape: f32[1,512], index: 7, kind: input, shape index: {}]   ;;  %s2116_s8 = inlined_call_operand.hbm [shape: bf16[512,128], index: 8, kind: input, shape index: {}]   ;;  %s2117_s9 = inlined_call_operand.vmem [shape: f32[1,128], index: 9, kind: input, shape index: {}]   ;;  %s2118_s10 = inlined_call_operand.vmem [shape: f32[1,128], index: 10, kind: input, shape index: {}]   ;;  %s2119_s11 = inlined_call_operand.hbm [shape: f32[8,128], index: 11, kind: output, shape index: {}]  }
   0x1   :  { %18 = vsyncpa [#allocation7], 0 }
   0x2   :  { %19 = vsyncpa [#allocation10], 0 }
   0x3   :  { %20 = vsyncpa [#allocation13], 0  ;;  %s39_s19 = sshll.u32 %s2110_s2, 4  ;;  %s40_s19 = int_to_ptr.hbm [resolvable:$true] %s39_s19 }
   0x4   :  { %21 = vsyncpa [#allocation5], 0  ;;  %s1975_s20 = smov [#allocation6]   ;;  %s65_s24 = sshll.u32 %s2113_s5, 4  ;;  %s66_s24 = int_to_ptr.hbm [resolvable:$true] %s65_s24 }
   0x5   :  { %s41_s21 = sshll.u32 %s1975_s20, 4  ;;  %s1976_s25 = smov 128   ;;  %s42_s21 = int_to_ptr.vmem [resolvable:$true] %s41_s21 }
   0x6   :  { %s1977_s26 = smov 8   ;;  %s1978_s27 = smov [#allocation9]  }
   0x7   :  { %47 = dma.hbm_to_vmem [thread:$0]  %s40_s19, 2048, %s42_s21, [#allocation7], %s1976_s25, %s1976_s25, %s1977_s26  }
   0x8   :  { %s67_s28 = sshll.u32 %s1978_s27, 4  ;;  %s1979_s29 = smov 256   ;;  %s68_s28 = int_to_ptr.vmem [resolvable:$true] %s67_s28 }
   0x9   :  { %s1980_s30 = smov 16   ;;  %s29_s13 = sshll.u32 %s2109_s1, 4  ;;  %s30_s13 = int_to_ptr.hbm [resolvable:$true] %s29_s13 }
   0xa   :  { %73 = dma.hbm_to_vmem [thread:$0]  %s66_s24, 8192, %s68_s28, [#allocation10], %s1979_s29, %s1979_s29, %s1980_s30  }
   0xb   :  { %s1981_s14 = smov [#allocation3]   ;;  %s55_s17 = sshll.u32 %s2112_s4, 4  ;;  %s56_s17 = int_to_ptr.hbm [resolvable:$true] %s55_s17 }
   0xc   :  { %s31_s15 = sshll.u32 %s1981_s14, 4  ;;  %s1982_s18 = smov [#allocation8]   ;;  %s32_s15 = int_to_ptr.vmem [resolvable:$true] %s31_s15 }
   0xd   :  { %34 = dma.hbm_to_vmem [thread:$0]  %s30_s13, 128, %s32_s15, [#allocation4]  }
   0xe   :  { %s57_s19 = sshll.u32 %s1982_s18, 4  ;;  %s81_s22 = sshll.u32 %s2115_s7, 4  ;;  %s58_s19 = int_to_ptr.vmem [resolvable:$true] %s57_s19  ;;  %s82_s22 = int_to_ptr.hbm [resolvable:$true] %s81_s22 }
   0xf   :  { %60 = dma.hbm_to_vmem [thread:$0]  %s56_s17, 32, %s58_s19, [#allocation7]  }
  0x10   :  { %s91_s24 = sshll.u32 %s2116_s8, 4  ;;  %s1983_s25 = smov [#allocation11]   ;;  %s92_s24 = int_to_ptr.hbm [resolvable:$true] %s91_s24 }
  0x11   :  { %s83_s26 = sshll.u32 %s1983_s25, 4  ;;  %s1984_s4 = smov [#allocation12]   ;;  %s84_s26 = int_to_ptr.vmem [resolvable:$true] %s83_s26 }
  0x12   :  { %86 = dma.hbm_to_vmem [thread:$0]  %s82_s22, 64, %s84_s26, [#allocation10]  }
  0x13   :  { %s93_s27 = sshll.u32 %s1984_s4, 4  ;;  %s1985_s28 = smov 64   ;;  %s94_s27 = int_to_ptr.vmem [resolvable:$true] %s93_s27 }
  0x14   :  { %s1986_s29 = smov 4  }
  0x15   :  { %99 = dma.hbm_to_vmem [thread:$0]  %s92_s24, 4096, %s94_s27, [#allocation13], %s1985_s28, %s1985_s28, %s1986_s29  }
  0x16   :  { %1965 = dma.done.wait [#allocation4], 128  }
  0x17   :  { %1966 = vsyncadd [#allocation4], 4294967168 }
  0x18   :  { %1967 = dma.done.wait [#allocation7], 2080  }
  0x19   :  { %1968 = vsyncadd [#allocation7], 4294965216 }
  0x1a   :  { %1969 = dma.done.wait [#allocation10], 8256  }
  0x1b   :  { %1970 = vsyncadd [#allocation10], 4294959040 }
  0x1c   :  { %1971 = dma.done.wait [#allocation13], 4096  }
  0x1d   :  { %1972 = vsyncadd [#allocation13], 4294963200  ;;  %v1218_v0 = vld [vmem:[#allocation6 + $0x70] sm:$0xf]  ;;  %v1629_v1 = vld [vmem:[#allocation6 + $0x74] sm:$0xf0]  ;;  %v130_v20 = vstv %s2108_s0 }
  0x1e   :  { %v1628_v2 = vld [vmem:[#allocation6 + $0x74] sm:$0xf]  ;;  %v1219_v3 = vor.u32 %v1629_v1, %v1218_v0  ;;  %v1220_v4 = vld [vmem:[#allocation6 + $0x78] sm:$0xf0]  ;;  %v1210_v5 = vld [vmem:[#allocation6 + $0x60] sm:$0xf] }
  0x1f   :  { %v1627_v6 = vld [vmem:[#allocation6 + $0x64] sm:$0xf0]  ;;  %v1223_v7 = vor.u32 %v1628_v2, %v1220_v4  ;;  %v1626_v8 = vld [vmem:[#allocation6 + $0x64] sm:$0xf]  ;;  %v1212_v9 = vld [vmem:[#allocation6 + $0x68] sm:$0xf0] }
  0x20   :  { %232 = vmatpush.bf16.msra.mxu0 %v1219_v3  ;;  %v1211_v10 = vor.u32 %v1627_v6, %v1210_v5  ;;  %v1215_v11 = vor.u32 %v1626_v8, %v1212_v9  ;;  %v1202_v12 = vld [vmem:[#allocation6 + $0x50] sm:$0xf]  ;;  %v1625_v13 = vld [vmem:[#allocation6 + $0x54] sm:$0xf0]  ;;  %v1624_v14 = vld [vmem:[#allocation6 + $0x54] sm:$0xf] }
  0x21   :  { %245 = vmatpush.bf16.msra.mxu1 %v1223_v7  ;;  %v1204_v15 = vld [vmem:[#allocation6 + $0x58] sm:$0xf0]  ;;  %v1203_v16 = vor.u32 %v1625_v13, %v1202_v12  ;;  %v1194_v18 = vld [vmem:[#allocation6 + $0x40] sm:$0xf]  ;;  %v1623_v19 = vld [vmem:[#allocation6 + $0x44] sm:$0xf0] }
  0x22   :  { %v1207_v17 = vor.u32 %v1624_v14, %v1204_v15  ;;  %v1622_v21 = vld [vmem:[#allocation6 + $0x44] sm:$0xf]  ;;  %v1196_v22 = vld [vmem:[#allocation6 + $0x48] sm:$0xf0]  ;;  %v128_v23 = vld [vmem:[#allocation3] sm:$0xff]  ;;  %v1195_v24 = vor.u32 %v1623_v19, %v1194_v18  ;;  %s1987_s15 = smov [#allocation14]  }
  0x23   :  { %v2069_v25 = vmul.f32 %v130_v20, %v128_v23  ;;  %v1340_v26 = vld [vmem:[#allocation9 + $0xe0] sm:$0xf]  ;;  %v1660_v27 = vld [vmem:[#allocation9 + $0xec] sm:$0xf0]  ;;  %v1199_v29 = vor.u32 %v1622_v21, %v1196_v22  ;;  %v1621_v31 = vld [vmem:[#allocation6 + $0x34] sm:$0xf0] }
  0x24   :  { %233 = vmatpush.bf16.msra.mxu0 %v1211_v10  ;;  %v1468_v28 = vld [vmem:[#allocation9 + $0x1e0] sm:$0xf]  ;;  %v1186_v30 = vld [vmem:[#allocation6 + $0x30] sm:$0xf]  ;;  %v1341_v32 = vor.u32 %v1660_v27, %v1340_v26  ;;  %v1620_v34 = vld [vmem:[#allocation6 + $0x34] sm:$0xf] }
  0x25   :  { %246 = vmatpush.bf16.msra.mxu1 %v1215_v11  ;;  %v1692_v33 = vld [vmem:[#allocation9 + $0x1ec] sm:$0xf0]  ;;  %v1188_v35 = vld [vmem:[#allocation6 + $0x38] sm:$0xf0]  ;;  %v1178_v36 = vld [vmem:[#allocation6 + $0x20] sm:$0xf]  ;;  %v1728_v37 = vcvt.f32.s32 %v2069_v25  ;;  %v1187_v42 = vor.u32 %v1621_v31, %v1186_v30 }
  0x26   :  { %v1469_v38 = vor.u32 %v1692_v33, %v1468_v28  ;;  %v1619_v39 = vld [vmem:[#allocation6 + $0x24] sm:$0xf0]  ;;  %668 = vmatpush.bf16.msra.mxu2 %v1341_v32  ;;  %v1324_v40 = vld [vmem:[#allocation9 + $0xc0] sm:$0xf]  ;;  %v1656_v41 = vld [vmem:[#allocation9 + $0xcc] sm:$0xf0]  ;;  %v1191_v48 = vor.u32 %v1620_v34, %v1188_v35 }
  0x27   :  { %v1729_v43 = vcvt.s32.f32 %v1728_v37  ;;  %v1731_v44 = vand.u32 2147483648, %v2069_v25  ;;  %v1325_v45 = vor.u32 %v1656_v41, %v1324_v40  ;;  %v1452_v46 = vld [vmem:[#allocation9 + $0x1c0] sm:$0xf]  ;;  %v1688_v47 = vld [vmem:[#allocation9 + $0x1cc] sm:$0xf0]  ;;  %v1179_v55 = vor.u32 %v1619_v39, %v1178_v36  ;;  %s1144_s16 = sshll.u32 %s1987_s15, 4  ;;  %s1145_s16 = int_to_ptr.vmem [resolvable:$true] %s1144_s16 }
  0x28   :  { %234 = vmatpush.bf16.msra.mxu0 %v1203_v16  ;;  %681 = vmatpush.bf16.msra.mxu3 %v1469_v38  ;;  %v1618_v49 = vld [vmem:[#allocation6 + $0x24] sm:$0xf]  ;;  %v1726_v50 = vand.u32 2147483647, %v2069_v25  ;;  %v1453_v51 = vor.u32 %v1688_v47, %v1452_v46  ;;  %v1180_v52 = vld [vmem:[#allocation6 + $0x28] sm:$0xf0] }
  0x29   :  { %247 = vmatpush.bf16.msra.mxu1 %v1207_v17  ;;  %v1730_v53 = vand.u32 2147483647, %v1729_v43  ;;  %v1308_v54 = vld [vmem:[#allocation9 + $0xa0] sm:$0xf]  ;;  %v1652_v56 = vld [vmem:[#allocation9 + $0xac] sm:$0xf0]  ;;  %v1183_v1 = vor.u32 %v1618_v49, %v1180_v52 }
  0x2a   :  { %669 = vmatpush.bf16.msra.mxu2 %v1325_v45  ;;  %v1436_v57 = vld [vmem:[#allocation9 + $0x1a0] sm:$0xf]  ;;  %v1684_v58 = vld [vmem:[#allocation9 + $0x1ac] sm:$0xf0]  ;;  %v1617_v60 = vld [vmem:[#allocation6 + $0x14] sm:$0xf0]  ;;  %v1309_v63 = vor.u32 %v1652_v56, %v1308_v54 }
  0x2b   :  { %v1170_v59 = vld [vmem:[#allocation6 + $0x10] sm:$0xf]  ;;  %v1616_v61 = vld [vmem:[#allocation6 + $0x14] sm:$0xf]  ;;  %v1732_v62 = vor.u32 %v1731_v44, %v1730_v53  ;;  %v1437_v0 = vor.u32 %v1684_v58, %v1436_v57  ;;  %vm2074_vm0 = vcmp.lt.f32.partialorder %v1726_v50, 8388608.0  ;;  %s1146_s18 = sshll.u32 %s2119_s11, 4  ;;  %s1147_s18 = int_to_ptr.hbm [resolvable:$true] %s1146_s18 }
  0x2c   :  { %235 = vmatpush.bf16.msra.mxu0 %v1195_v24  ;;  %682 = vmatpush.bf16.msra.mxu3 %v1453_v51  ;;  %v1292_v3 = vld [vmem:[#allocation9 + $0x80] sm:$0xf]  ;;  %v1648_v4 = vld [vmem:[#allocation9 + $0x8c] sm:$0xf0]  ;;  %v1172_v5 = vld [vmem:[#allocation6 + $0x18] sm:$0xf0]  ;;  %v1171_v10 = vor.u32 %v1617_v60, %v1170_v59 }
  0x2d   :  { %248 = vmatpush.bf16.msra.mxu1 %v1199_v29  ;;  %v1420_v6 = vld [vmem:[#allocation9 + $0x180] sm:$0xf]  ;;  %v1680_v7 = vld [vmem:[#allocation9 + $0x18c] sm:$0xf0]  ;;  %v1293_v9 = vor.u32 %v1648_v4, %v1292_v3  ;;  %v1615_v11 = vld [vmem:[#allocation6 + $0x4] sm:$0xf0]  ;;  %v1733_v12 = vsel %vm2074_vm0, %v1732_v62, %v2069_v25  ;;  %v1175_v16 = vor.u32 %v1616_v61, %v1172_v5 }
  0x2e   :  { %v1162_v8 = vld [vmem:[#allocation6] sm:$0xf]  ;;  %670 = vmatpush.bf16.msra.mxu2 %v1309_v63  ;;  %v1421_v13 = vor.u32 %v1680_v7, %v1420_v6  ;;  %v1644_v15 = vld [vmem:[#allocation9 + $0x6c] sm:$0xf0]  ;;  %v1614_v17 = vld [vmem:[#allocation6 + $0x4] sm:$0xf] }
  0x2f   :  { %v1276_v14 = vld [vmem:[#allocation9 + $0x60] sm:$0xf]  ;;  %v1676_v19 = vld [vmem:[#allocation9 + $0x16c] sm:$0xf0]  ;;  %v1164_v20 = vld [vmem:[#allocation6 + $0x8] sm:$0xf0]  ;;  %v1163_v28 = vor.u32 %v1615_v11, %v1162_v8 }
  0x30   :  { %236 = vmatpush.bf16.msra.mxu0 %v1187_v42  ;;  %683 = vmatpush.bf16.msra.mxu3 %v1437_v0  ;;  %v1404_v18 = vld [vmem:[#allocation9 + $0x160] sm:$0xf]  ;;  %v1658_v21 = vld [vmem:[#allocation9 + $0xe4] sm:$0xf]  ;;  %v1342_v22 = vld [vmem:[#allocation9 + $0xf0] sm:$0xf0]  ;;  %v1277_v27 = vor.u32 %v1644_v15, %v1276_v14  ;;  %v1167_v31 = vor.u32 %v1614_v17, %v1164_v20 }
  0x31   :  { %249 = vmatpush.bf16.msra.mxu1 %v1191_v48  ;;  %v1159_v23 = vclamps-f32 %v1733_v12, 127.0  ;;  %v1690_v24 = vld [vmem:[#allocation9 + $0x1e4] sm:$0xf]  ;;  %v1470_v26 = vld [vmem:[#allocation9 + $0x1f0] sm:$0xf0]  ;;  %v1405_v25 = vor.u32 %v1676_v19, %v1404_v18  ;;  %v1345_v32 = vor.u32 %v1658_v21, %v1342_v22 }
  0x32   :  { %671 = vmatpush.bf16.msra.mxu2 %v1293_v9  ;;  %v1260_v29 = vld [vmem:[#allocation9 + $0x40] sm:$0xf]  ;;  %v1640_v30 = vld [vmem:[#allocation9 + $0x4c] sm:$0xf0]  ;;  %v1473_v35 = vor.u32 %v1690_v24, %v1470_v26  ;;  %v1654_v36 = vld [vmem:[#allocation9 + $0xc4] sm:$0xf] }
  0x33   :  { %v1388_v33 = vld [vmem:[#allocation9 + $0x140] sm:$0xf]  ;;  %v1672_v34 = vld [vmem:[#allocation9 + $0x14c] sm:$0xf0]  ;;  %v1326_v37 = vld [vmem:[#allocation9 + $0xd0] sm:$0xf0]  ;;  %v135_v38 = vpack.c.bf16 %v1159_v23, %v1159_v23  ;;  %v1261_v41 = vor.u32 %v1640_v30, %v1260_v29 }
  0x34   :  { %237 = vmatpush.bf16.msra.mxu0 %v1179_v55  ;;  %684 = vmatpush.bf16.msra.mxu3 %v1421_v13  ;;  %v1686_v39 = vld [vmem:[#allocation9 + $0x1c4] sm:$0xf]  ;;  %v1454_v40 = vld [vmem:[#allocation9 + $0x1d0] sm:$0xf0]  ;;  %v1389_v42 = vor.u32 %v1672_v34, %v1388_v33  ;;  %v1329_v43 = vor.u32 %v1654_v36, %v1326_v37  ;;  %v1244_v5 = vld [vmem:[#allocation9 + $0x20] sm:$0xf] }
  0x35   :  { %250 = vmatpush.bf16.msra.mxu1 %v1183_v1  ;;  %v1457_v44 = vor.u32 %v1686_v39, %v1454_v40  ;;  %v1650_v45 = vld [vmem:[#allocation9 + $0xa4] sm:$0xf]  ;;  %v1310_v46 = vld [vmem:[#allocation9 + $0xb0] sm:$0xf0]  ;;  %v1636_v6 = vld [vmem:[#allocation9 + $0x2c] sm:$0xf0] }
  0x36   :  { %672 = vmatpush.bf16.msra.mxu2 %v1277_v27  ;;  %v1682_v47 = vld [vmem:[#allocation9 + $0x1a4] sm:$0xf]  ;;  %v1438_v48 = vld [vmem:[#allocation9 + $0x1b0] sm:$0xf0]  ;;  %v1313_v49 = vor.u32 %v1650_v45, %v1310_v46  ;;  %v1372_v7 = vld [vmem:[#allocation9 + $0x120] sm:$0xf]  ;;  %v1245_v8 = vor.u32 %v1636_v6, %v1244_v5 }
  0x37   :  { %v1441_v50 = vor.u32 %v1682_v47, %v1438_v48  ;;  %v1646_v51 = vld [vmem:[#allocation9 + $0x84] sm:$0xf]  ;;  %v1294_v52 = vld [vmem:[#allocation9 + $0x90] sm:$0xf0]  ;;  %v1668_v9 = vld [vmem:[#allocation9 + $0x12c] sm:$0xf0] }
  0x38   :  { %238 = vmatpush.bf16.msra.mxu0 %v1171_v10  ;;  %685 = vmatpush.bf16.msra.mxu3 %v1405_v25  ;;  %v1678_v53 = vld [vmem:[#allocation9 + $0x184] sm:$0xf]  ;;  %v1422_v54 = vld [vmem:[#allocation9 + $0x190] sm:$0xf0]  ;;  %v1297_v55 = vor.u32 %v1646_v51, %v1294_v52  ;;  %v1373_v11 = vor.u32 %v1668_v9, %v1372_v7  ;;  %v1228_v17 = vld [vmem:[#allocation9] sm:$0xf] }
  0x39   :  { %251 = vmatpush.bf16.msra.mxu1 %v1175_v16  ;;  %v1425_v56 = vor.u32 %v1678_v53, %v1422_v54  ;;  %v1642_v57 = vld [vmem:[#allocation9 + $0x64] sm:$0xf]  ;;  %v1278_v58 = vld [vmem:[#allocation9 + $0x70] sm:$0xf0]  ;;  %v1632_v18 = vld [vmem:[#allocation9 + $0xc] sm:$0xf0] }
  0x3a   :  { %673 = vmatpush.bf16.msra.mxu2 %v1261_v41  ;;  %v1674_v59 = vld [vmem:[#allocation9 + $0x164] sm:$0xf]  ;;  %v1406_v60 = vld [vmem:[#allocation9 + $0x170] sm:$0xf0]  ;;  %v1281_v61 = vor.u32 %v1642_v57, %v1278_v58  ;;  %v1229_v19 = vor.u32 %v1632_v18, %v1228_v17  ;;  %v1356_v20 = vld [vmem:[#allocation9 + $0x100] sm:$0xf] }
  0x3b   :  { %v1409_v62 = vor.u32 %v1674_v59, %v1406_v60  ;;  %v1638_v63 = vld [vmem:[#allocation9 + $0x44] sm:$0xf]  ;;  %v1262_v0 = vld [vmem:[#allocation9 + $0x50] sm:$0xf0]  ;;  %v1664_v21 = vld [vmem:[#allocation9 + $0x10c] sm:$0xf0] }
  0x3c   :  { %239 = vmatpush.bf16.msra.mxu0 %v1163_v28  ;;  %686 = vmatpush.bf16.msra.mxu3 %v1389_v42  ;;  %v1670_v1 = vld [vmem:[#allocation9 + $0x144] sm:$0xf]  ;;  %v1390_v2 = vld [vmem:[#allocation9 + $0x150] sm:$0xf0]  ;;  %v1265_v3 = vor.u32 %v1638_v63, %v1262_v0  ;;  %v1357_v23 = vor.u32 %v1664_v21, %v1356_v20  ;;  %v1348_v29 = vld [vmem:[#allocation9 + $0xe8] sm:$0xf] }
  0x3d   :  { %252 = vmatpush.bf16.msra.mxu1 %v1167_v31  ;;  %v1393_v4 = vor.u32 %v1670_v1, %v1390_v2  ;;  %v1634_v10 = vld [vmem:[#allocation9 + $0x24] sm:$0xf]  ;;  %v1246_v12 = vld [vmem:[#allocation9 + $0x30] sm:$0xf0]  ;;  %v1661_v30 = vld [vmem:[#allocation9 + $0xf4] sm:$0xf0] }
  0x3e   :  { %v1666_v13 = vld [vmem:[#allocation9 + $0x124] sm:$0xf]  ;;  %674 = vmatpush.bf16.msra.mxu2 %v1245_v8  ;;  %v1249_v14 = vor.u32 %v1634_v10, %v1246_v12  ;;  %v1374_v15 = vld [vmem:[#allocation9 + $0x130] sm:$0xf0]  ;;  %v1476_v31 = vld [vmem:[#allocation9 + $0x1e8] sm:$0xf] }
  0x3f   :  { %240 = vmatmul.bf16.vlgmr.msra.gmra.mxu0 %v135_v38  ;;  %v1377_v16 = vor.u32 %v1666_v13, %v1374_v15  ;;  %v1630_v22 = vld [vmem:[#allocation9 + $0x4] sm:$0xf]  ;;  %v1230_v24 = vld [vmem:[#allocation9 + $0x10] sm:$0xf0]  ;;  %v1693_v33 = vld [vmem:[#allocation9 + $0x1f4] sm:$0xf0] }
  0x40   :  { %694 = vmatpush.bf16.msrb.mxu0 %v1345_v32  ;;  %253 = vmatmul.bf16.vlgmr.msra.gmra.mxu1 %v135_v38  ;;  %v1662_v26 = vld [vmem:[#allocation9 + $0x104] sm:$0xf]  ;;  %v1358_v27 = vld [vmem:[#allocation9 + $0x110] sm:$0xf0]  ;;  %v1233_v28 = vor.u32 %v1630_v22, %v1230_v24  ;;  %v1349_v32 = vor.u32 %v1661_v30, %v1348_v29  ;;  %v1659_v34 = vld [vmem:[#allocation9 + $0xec] sm:$0xf]  ;;  %v1477_v36 = vor.u32 %v1693_v33, %v1476_v31 }
  0x41   :  { %707 = vmatpush.bf16.msrb.mxu1 %v1473_v35  ;;  %687 = vmatpush.bf16.msra.mxu3 %v1373_v11  ;;  %v1361_v25 = vor.u32 %v1662_v26, %v1358_v27  ;;  %v1350_v35 = vld [vmem:[#allocation9 + $0xf8] sm:$0xf0]  ;;  %v1691_v38 = vld [vmem:[#allocation9 + $0x1ec] sm:$0xf]  ;;  %v1332_v40 = vld [vmem:[#allocation9 + $0xc8] sm:$0xf] }
  0x42   :  { %675 = vmatpush.bf16.msra.mxu2 %v1229_v19  ;;  %v1353_v37 = vor.u32 %v1659_v34, %v1350_v35  ;;  %v1478_v39 = vld [vmem:[#allocation9 + $0x1f8] sm:$0xf0]  ;;  %v1657_v42 = vld [vmem:[#allocation9 + $0xd4] sm:$0xf0]  ;;  %v1655_v47 = vld [vmem:[#allocation9 + $0xcc] sm:$0xf] }
  0x43   :  { %v1481_v41 = vor.u32 %v1691_v38, %v1478_v39  ;;  %v1333_v45 = vor.u32 %v1657_v42, %v1332_v40  ;;  %v1334_v48 = vld [vmem:[#allocation9 + $0xd8] sm:$0xf0]  ;;  %v1316_v53 = vld [vmem:[#allocation9 + $0xa8] sm:$0xf]  ;;  %v1653_v54 = vld [vmem:[#allocation9 + $0xb4] sm:$0xf0] }
  0x44   :  { %695 = vmatpush.bf16.msrb.mxu0 %v1329_v43  ;;  %v1460_v43 = vld [vmem:[#allocation9 + $0x1c8] sm:$0xf]  ;;  %v1462_v51 = vld [vmem:[#allocation9 + $0x1d8] sm:$0xf0]  ;;  %v1685_v57 = vld [vmem:[#allocation9 + $0x1b4] sm:$0xf0] }
  0x45   :  { %708 = vmatpush.bf16.msrb.mxu1 %v1457_v44  ;;  %688 = vmatpush.bf16.msra.mxu3 %v1357_v23  ;;  %v1689_v44 = vld [vmem:[#allocation9 + $0x1d4] sm:$0xf0]  ;;  %v1651_v58 = vld [vmem:[#allocation9 + $0xac] sm:$0xf]  ;;  %v1318_v59 = vld [vmem:[#allocation9 + $0xb8] sm:$0xf0] }
  0x46   :  { %720 = vmatpush.bf16.msrb.mxu2 %v1349_v32  ;;  %v1461_v46 = vor.u32 %v1689_v44, %v1460_v43  ;;  %v1446_v63 = vld [vmem:[#allocation9 + $0x1b8] sm:$0xf0]  ;;  %v1300_v0 = vld [vmem:[#allocation9 + $0x88] sm:$0xf]  ;;  %v1649_v2 = vld [vmem:[#allocation9 + $0x94] sm:$0xf0] }
  0x47   :  { %v1647_v5 = vld [vmem:[#allocation9 + $0x8c] sm:$0xf]  ;;  %v1302_v6 = vld [vmem:[#allocation9 + $0x98] sm:$0xf0]  ;;  %v1301_v8 = vor.u32 %v1649_v2, %v1300_v0  ;;  %v1284_v13 = vld [vmem:[#allocation9 + $0x68] sm:$0xf] }
  0x48   :  { %696 = vmatpush.bf16.msrb.mxu0 %v1313_v49  ;;  %v1687_v49 = vld [vmem:[#allocation9 + $0x1cc] sm:$0xf]  ;;  %v1430_v9 = vld [vmem:[#allocation9 + $0x198] sm:$0xf0]  ;;  %v1305_v11 = vor.u32 %v1647_v5, %v1302_v6  ;;  %v1412_v15 = vld [vmem:[#allocation9 + $0x168] sm:$0xf] }
  0x49   :  { %709 = vmatpush.bf16.msrb.mxu1 %v1441_v50  ;;  %733 = vmatpush.bf16.msrb.mxu3 %v1477_v36  ;;  %v1337_v50 = vor.u32 %v1655_v47, %v1334_v48  ;;  %v1465_v52 = vor.u32 %v1687_v49, %v1462_v51  ;;  %v1679_v7 = vld [vmem:[#allocation9 + $0x18c] sm:$0xf]  ;;  %v1677_v17 = vld [vmem:[#allocation9 + $0x174] sm:$0xf0]  ;;  %v1286_v19 = vld [vmem:[#allocation9 + $0x78] sm:$0xf0] }
  0x4a   :  { %721 = vmatpush.bf16.msrb.mxu2 %v1333_v45  ;;  %v1433_v12 = vor.u32 %v1679_v7, %v1430_v9  ;;  %v1643_v18 = vld [vmem:[#allocation9 + $0x6c] sm:$0xf]  ;;  %v1413_v20 = vor.u32 %v1677_v17, %v1412_v15  ;;  %v1414_v23 = vld [vmem:[#allocation9 + $0x178] sm:$0xf0]  ;;  %v1268_v24 = vld [vmem:[#allocation9 + $0x48] sm:$0xf] }
  0x4b   :  { %v1289_v21 = vor.u32 %v1643_v18, %v1286_v19  ;;  %v1675_v22 = vld [vmem:[#allocation9 + $0x16c] sm:$0xf]  ;;  %v1641_v27 = vld [vmem:[#allocation9 + $0x54] sm:$0xf0]  ;;  %v1270_v30 = vld [vmem:[#allocation9 + $0x58] sm:$0xf0] }
  0x4c   :  { %697 = vmatpush.bf16.msrb.mxu0 %v1297_v55  ;;  %v1444_v55 = vld [vmem:[#allocation9 + $0x1a8] sm:$0xf]  ;;  %v1417_v26 = vor.u32 %v1675_v22, %v1414_v23  ;;  %v1639_v29 = vld [vmem:[#allocation9 + $0x4c] sm:$0xf]  ;;  %v258_v32 = vld [vmem:[%s2111_s3] sm:$0x3]  ;;  %v1269_v33 = vor.u32 %v1641_v27, %v1268_v24 }
  0x4d   :  { %710 = vmatpush.bf16.msrb.mxu1 %v1425_v56  ;;  %v1317_v56 = vor.u32 %v1653_v54, %v1316_v53  ;;  %734 = vmatpush.bf16.msrb.mxu3 %v1461_v46  ;;  %v1445_v60 = vor.u32 %v1685_v57, %v1444_v55  ;;  %v1671_v31 = vld [vmem:[#allocation9 + $0x14c] sm:$0xf]  ;;  %v1398_v34 = vld [vmem:[#allocation9 + $0x158] sm:$0xf0]  ;;  %v1273_v36 = vor.u32 %v1639_v29, %v1270_v30  ;;  %v1637_v38 = vld [vmem:[#allocation9 + $0x34] sm:$0xf0] }
  0x4e   :  { %v1380_v39 = vld [vmem:[#allocation9 + $0x128] sm:$0xf]  ;;  %v1401_v40 = vor.u32 %v1671_v31, %v1398_v34  ;;  %v1635_v42 = vld [vmem:[#allocation9 + $0x2c] sm:$0xf]  ;;  %v1254_v43 = vld [vmem:[#allocation9 + $0x38] sm:$0xf0] }
  0x4f   :  { %722 = vmatpush.bf16.msrb.mxu2 %v1317_v56  ;;  %v1667_v44 = vld [vmem:[#allocation9 + $0x12c] sm:$0xf]  ;;  %v1382_v45 = vld [vmem:[#allocation9 + $0x138] sm:$0xf0]  ;;  %v260_v46 = vperm.slane %v258_v32, 0  ;;  %v261_v48 = vperm.slane %v258_v32, 1  ;;  %v1257_v51 = vor.u32 %v1635_v42, %v1254_v43 }
  0x50   :  { %698 = vmatpush.bf16.msrb.mxu0 %v1281_v61  ;;  %v1321_v61 = vor.u32 %v1651_v58, %v1318_v59  ;;  %v266_v47 = vld [vmem:[#allocation8] sm:$0x3]  ;;  %v1633_v53 = vld [vmem:[#allocation9 + $0x14] sm:$0xf0]  ;;  %v1364_v54 = vld [vmem:[#allocation9 + $0x108] sm:$0xf]  ;;  %v1385_v55 = vor.u32 %v1667_v44, %v1382_v45 }
  0x51   :  { %711 = vmatpush.bf16.msrb.mxu1 %v1409_v62  ;;  %v1683_v62 = vld [vmem:[#allocation9 + $0x1ac] sm:$0xf]  ;;  %735 = vmatpush.bf16.msrb.mxu3 %v1445_v60  ;;  %v1665_v56 = vld [vmem:[#allocation9 + $0x114] sm:$0xf0]  ;;  %v1238_v58 = vld [vmem:[#allocation9 + $0x18] sm:$0xf0] }
  0x52   :  { %v1449_v1 = vor.u32 %v1683_v62, %v1446_v63  ;;  %v1631_v57 = vld [vmem:[#allocation9 + $0xc] sm:$0xf]  ;;  %v268_v59 = vperm.slane %v266_v47, 0  ;;  %v269_v63 = vperm.slane %v266_v47, 1  ;;  %v1709_v30 = vld [vmem:[#allocation12 + $0x78] sm:$0xff]  ;;  %v1724_v42 = vld [vmem:[#allocation12 + $0xf0] sm:$0xff] }
  0x53   :  { %723 = vmatpush.bf16.msrb.mxu2 %v1301_v8  ;;  %v1663_v60 = vld [vmem:[#allocation9 + $0x10c] sm:$0xf]  ;;  %v1701_v31 = vld [vmem:[#allocation12 + $0x38] sm:$0xff]  ;;  %v1696_v47 = vld [vmem:[#allocation12 + $0x10] sm:$0xff] }
  0x54   :  { %699 = vmatpush.bf16.msrb.mxu0 %v1265_v3  ;;  %v1428_v3 = vld [vmem:[#allocation9 + $0x188] sm:$0xf]  ;;  %v1707_v34 = vld [vmem:[#allocation12 + $0x68] sm:$0xff]  ;;  %v1697_v43 = vld [vmem:[#allocation12 + $0x18] sm:$0xff] }
  0x55   :  { %712 = vmatpush.bf16.msrb.mxu1 %v1393_v4  ;;  %v1681_v4 = vld [vmem:[#allocation9 + $0x194] sm:$0xf0]  ;;  %v1717_v44 = vld [vmem:[#allocation12 + $0xb8] sm:$0xff]  ;;  %v1703_v45 = vld [vmem:[#allocation12 + $0x48] sm:$0xff] }
  0x56   :  { %v1429_v10 = vor.u32 %v1681_v4, %v1428_v3  ;;  %v1365_v3 = vor.u32 %v1665_v56, %v1364_v54  ;;  %v1241_v4 = vor.u32 %v1631_v57, %v1238_v58  ;;  %v1694_v54 = vld [vmem:[#allocation12] sm:$0xff]  ;;  %v1720_v56 = vld [vmem:[#allocation12 + $0xd0] sm:$0xff]  ;;  %v1713_v57 = vld [vmem:[#allocation12 + $0x98] sm:$0xff] }
  0x57   :  { %v2087_v58 = vld [vmem:[%s2114_s6] sm:$0xf] }
  0x58   :  { %700 = vmatpush.bf16.msrb.mxu0 %v1249_v14  ;;  %v1645_v14 = vld [vmem:[#allocation9 + $0x74] sm:$0xf0]  ;;  %736 = vmatpush.bf16.msrb.mxu3 %v1429_v10 }
  0x59   :  { %713 = vmatpush.bf16.msrb.mxu1 %v1377_v16  ;;  %v1285_v16 = vor.u32 %v1645_v14, %v1284_v13 }
  0x5b   :  { %724 = vmatpush.bf16.msrb.mxu2 %v1285_v16 }
  0x5c   :  { %701 = vmatpush.bf16.msrb.mxu0 %v1233_v28  ;;  %v1396_v28 = vld [vmem:[#allocation9 + $0x148] sm:$0xf]  ;;  %737 = vmatpush.bf16.msrb.mxu3 %v1413_v20 }
  0x5d   :  { %714 = vmatpush.bf16.msrb.mxu1 %v1361_v25  ;;  %v1673_v25 = vld [vmem:[#allocation9 + $0x154] sm:$0xf0] }
  0x5e   :  { %v1397_v35 = vor.u32 %v1673_v25, %v1396_v28 }
  0x5f   :  { %725 = vmatpush.bf16.msrb.mxu2 %v1269_v33  ;;  %v1708_v33 = vld [vmem:[#allocation12 + $0x70] sm:$0xff] }
  0x60   :  { %746 = vmatpush.bf16.msra.mxu0 %v1353_v37  ;;  %v1252_v37 = vld [vmem:[#allocation9 + $0x28] sm:$0xf]  ;;  %738 = vmatpush.bf16.msrb.mxu3 %v1397_v35  ;;  %v1700_v35 = vld [vmem:[#allocation12 + $0x30] sm:$0xff] }
  0x61   :  { %759 = vmatpush.bf16.msra.mxu1 %v1481_v41  ;;  %v1669_v41 = vld [vmem:[#allocation9 + $0x134] sm:$0xf0]  ;;  %v1253_v49 = vor.u32 %v1637_v38, %v1252_v37  ;;  %v1699_v37 = vld [vmem:[#allocation12 + $0x28] sm:$0xff]  ;;  %v1705_v38 = vld [vmem:[#allocation12 + $0x58] sm:$0xff] }
  0x63   :  { %726 = vmatpush.bf16.msrb.mxu2 %v1253_v49  ;;  %v1702_v49 = vld [vmem:[#allocation12 + $0x40] sm:$0xff] }
  0x64   :  { %747 = vmatpush.bf16.msra.mxu0 %v1337_v50  ;;  %v1381_v50 = vor.u32 %v1669_v41, %v1380_v39  ;;  %v1725_v39 = vld [vmem:[#allocation12 + $0xf8] sm:$0xff]  ;;  %v1704_v41 = vld [vmem:[#allocation12 + $0x50] sm:$0xff] }
  0x65   :  { %760 = vmatpush.bf16.msra.mxu1 %v1465_v52  ;;  %v1236_v52 = vld [vmem:[#allocation9 + $0x8] sm:$0xf] }
  0x66   :  { %v1237_v0 = vor.u32 %v1633_v53, %v1236_v52  ;;  %739 = vmatpush.bf16.msrb.mxu3 %v1381_v50  ;;  %v1722_v50 = vld [vmem:[#allocation12 + $0xe0] sm:$0xff]  ;;  %v1715_v52 = vld [vmem:[#allocation12 + $0xa8] sm:$0xff]  ;;  %v1721_v53 = vld [vmem:[#allocation12 + $0xd8] sm:$0xff] }
  0x68   :  { %748 = vmatpush.bf16.msra.mxu0 %v1321_v61  ;;  %v1366_v61 = vld [vmem:[#allocation9 + $0x118] sm:$0xf0]  ;;  %727 = vmatpush.bf16.msrb.mxu2 %v1237_v0 }
  0x69   :  { %761 = vmatpush.bf16.msra.mxu1 %v1449_v1  ;;  %v1369_v6 = vor.u32 %v1663_v60, %v1366_v61  ;;  %v2089_v60 = vld [vmem:[#allocation11] sm:$0xf] }
  0x6a   :  { %740 = vmatpush.bf16.msrb.mxu3 %v1365_v3  ;;  %v1718_v3 = vld [vmem:[#allocation12 + $0xc0] sm:$0xff] }
  0x6c   :  { %749 = vmatpush.bf16.msra.mxu0 %v1305_v11 }
  0x6d   :  { %762 = vmatpush.bf16.msra.mxu1 %v1433_v12 }
  0x70   :  { %750 = vmatpush.bf16.msra.mxu0 %v1289_v21 }
  0x71   :  { %763 = vmatpush.bf16.msra.mxu1 %v1417_v26 }
  0x74   :  { %751 = vmatpush.bf16.msra.mxu0 %v1273_v36  ;;  %v1706_v36 = vld [vmem:[#allocation12 + $0x60] sm:$0xff] }
  0x75   :  { %764 = vmatpush.bf16.msra.mxu1 %v1401_v40  ;;  %v1698_v40 = vld [vmem:[#allocation12 + $0x20] sm:$0xff] }
  0x78   :  { %752 = vmatpush.bf16.msra.mxu0 %v1257_v51  ;;  %v1695_v51 = vld [vmem:[#allocation12 + $0x8] sm:$0xff] }
  0x79   :  { %765 = vmatpush.bf16.msra.mxu1 %v1385_v55  ;;  %v1714_v55 = vld [vmem:[#allocation12 + $0xa0] sm:$0xff] }
  0x7c   :  { %753 = vmatpush.bf16.msra.mxu0 %v1241_v4 }
  0x7d   :  { %766 = vmatpush.bf16.msra.mxu1 %v1369_v6 }
  0xbc   :  { %v241_v62 = vpop.f32.mrf.mxu0 }
  0xbd   :  { %v264_v1 = vmul.f32 %v260_v46, %v241_v62  ;;  %v254_v2 = vpop.f32.mrf.mxu1  ;;  %v1723_v46 = vld [vmem:[#allocation12 + $0xe8] sm:$0xff]  ;;  %v775_v62 = vperm.slane %v2087_v58, 1 }
  0xbe   :  { %v265_v5 = vmul.f32 %v261_v48, %v254_v2  ;;  %v1716_v48 = vld [vmem:[#allocation12 + $0xb0] sm:$0xff]  ;;  %v789_v2 = vperm.slane %v2089_v60, 1 }
  0xbf   :  { %v272_v7 = vadd.f32 %v268_v59, %v264_v1  ;;  %v1719_v59 = vld [vmem:[#allocation12 + $0xc8] sm:$0xff] }
  0xc0   :  { %v273_v8 = vadd.f32 %v269_v63, %v265_v5  ;;  %v1712_v63 = vld [vmem:[#allocation12 + $0x90] sm:$0xff]  ;;  %v1711_v5 = vld [vmem:[#allocation12 + $0x88] sm:$0xff] }
  0xc1   :  { %v274_v9 = vmax.f32 %v272_v7, 0.0 }
  0xc2   :  { %v275_v10 = vmax.f32 %v273_v8, 0.0  ;;  %v774_v8 = vperm.slane %v2087_v58, 0 }
  0xc3   :  { %v1736_v11 = vcvt.f32.s32 %v274_v9  ;;  %v1734_v17 = vand.u32 2147483647, %v274_v9  ;;  %v1739_v19 = vand.u32 2147483648, %v274_v9 }
  0xc4   :  { %v1744_v12 = vcvt.f32.s32 %v275_v10  ;;  %v243_v13 = vpop.f32.mrf.mxu0  ;;  %v1742_v20 = vand.u32 2147483647, %v275_v10  ;;  %v1747_v22 = vand.u32 2147483648, %v275_v10 }
  0xc5   :  { %v1737_v14 = vcvt.s32.f32 %v1736_v11  ;;  %v256_v15 = vpop.f32.mrf.mxu1  ;;  %vm1735_vm1 = vcmp.lt.f32.partialorder %v1734_v17, 8388608.0  ;;  %v788_v13 = vperm.slane %v2089_v60, 0 }
  0xc6   :  { %v1745_v16 = vcvt.s32.f32 %v1744_v12  ;;  %vm1743_vm2 = vcmp.lt.f32.partialorder %v1742_v20, 8388608.0 }
  0xc7   :  { %v1738_v18 = vand.u32 2147483647, %v1737_v14 }
  0xc8   :  { %v1746_v21 = vand.u32 2147483647, %v1745_v16 }
  0xc9   :  { %v1740_v23 = vor.u32 %v1739_v19, %v1738_v18 }
  0xca   :  { %v1748_v24 = vor.u32 %v1747_v22, %v1746_v21 }
  0xcb   :  { %v1741_v26 = vsel %vm1735_vm1, %v1740_v23, %v274_v9 }
  0xcc   :  { %v1224_v27 = vclamps-f32 %v1741_v26, 127.0  ;;  %v1749_v28 = vsel %vm1743_vm2, %v1748_v24, %v275_v10  ;;  %v1710_v10 = vld [vmem:[#allocation12 + $0x80] sm:$0xff] }
  0xcd   :  { %v1225_v25 = vclamps-f32 %v1749_v28, 127.0 }
  0xce   :  { %v282_v29 = vpack.c.bf16 %v1224_v27, %v1224_v27 }
  0xcf   :  { %v283_v32 = vpack.c.bf16 %v1225_v25, %v1225_v25  ;;  %v777_v25 = vperm.slane %v2087_v58, 3 }
  0xd0   :  { %676 = vmatmul.bf16.vlgmr.msra.gmra.mxu2 %v282_v29  ;;  %702 = vmatmul.bf16.vlgmr.msrb.gmra.mxu0 %v282_v29 }
  0xd1   :  { %689 = vmatmul.bf16.vlgmr.msra.gmra.mxu3 %v283_v32  ;;  %715 = vmatmul.bf16.vlgmr.msrb.gmra.mxu1 %v283_v32 }
  0xd2   :  { %1089 = vmatpush.bf16.msra.mxu3 %v1709_v30  ;;  %1076 = vmatpush.bf16.msra.mxu2 %v1701_v31 }
  0xd3   :  { %1115 = vmatpush.bf16.msrb.mxu1 %v1725_v39  ;;  %1102 = vmatpush.bf16.msrb.mxu0 %v1717_v44 }
  0xd6   :  { %1090 = vmatpush.bf16.msra.mxu3 %v1708_v33  ;;  %1077 = vmatpush.bf16.msra.mxu2 %v1700_v35  ;;  %v791_v33 = vperm.slane %v2089_v60, 3 }
  0xd7   :  { %1116 = vmatpush.bf16.msrb.mxu1 %v1724_v42  ;;  %1103 = vmatpush.bf16.msrb.mxu0 %v1716_v48  ;;  %v790_v48 = vperm.slane %v2089_v60, 2 }
  0xda   :  { %1091 = vmatpush.bf16.msra.mxu3 %v1707_v34  ;;  %1078 = vmatpush.bf16.msra.mxu2 %v1699_v37 }
  0xdb   :  { %1117 = vmatpush.bf16.msrb.mxu1 %v1723_v46  ;;  %1104 = vmatpush.bf16.msrb.mxu0 %v1715_v52 }
  0xde   :  { %1092 = vmatpush.bf16.msra.mxu3 %v1706_v36  ;;  %1079 = vmatpush.bf16.msra.mxu2 %v1698_v40 }
  0xdf   :  { %1118 = vmatpush.bf16.msrb.mxu1 %v1722_v50  ;;  %1105 = vmatpush.bf16.msrb.mxu0 %v1714_v55 }
  0xe0   :  { %728 = vmatmul.bf16.vlgmr.msrb.gmra.mxu2 %v282_v29  ;;  %754 = vmatmul.bf16.vlgmr.msra.gmra.mxu0 %v282_v29 }
  0xe1   :  { %741 = vmatmul.bf16.vlgmr.msrb.gmra.mxu3 %v283_v32  ;;  %767 = vmatmul.bf16.vlgmr.msra.gmra.mxu1 %v283_v32 }
  0xe2   :  { %1093 = vmatpush.bf16.msra.mxu3 %v1705_v38  ;;  %1080 = vmatpush.bf16.msra.mxu2 %v1697_v43  ;;  %v776_v43 = vperm.slane %v2087_v58, 2 }
  0xe3   :  { %1119 = vmatpush.bf16.msrb.mxu1 %v1721_v53  ;;  %1106 = vmatpush.bf16.msrb.mxu0 %v1713_v57 }
  0xe6   :  { %1094 = vmatpush.bf16.msra.mxu3 %v1704_v41  ;;  %1081 = vmatpush.bf16.msra.mxu2 %v1696_v47 }
  0xe7   :  { %1120 = vmatpush.bf16.msrb.mxu1 %v1720_v56  ;;  %1107 = vmatpush.bf16.msrb.mxu0 %v1712_v63 }
  0xea   :  { %1095 = vmatpush.bf16.msra.mxu3 %v1703_v45  ;;  %1082 = vmatpush.bf16.msra.mxu2 %v1695_v51 }
  0xeb   :  { %1121 = vmatpush.bf16.msrb.mxu1 %v1719_v59  ;;  %1108 = vmatpush.bf16.msrb.mxu0 %v1711_v5 }
  0xee   :  { %1096 = vmatpush.bf16.msra.mxu3 %v1702_v49  ;;  %1083 = vmatpush.bf16.msra.mxu2 %v1694_v54 }
  0xef   :  { %1122 = vmatpush.bf16.msrb.mxu1 %v1718_v3  ;;  %1109 = vmatpush.bf16.msrb.mxu0 %v1710_v10 }
 0x14d   :  { %v703_v61 = vpop.f32.mrf.mxu0 }
 0x14e   :  { %v716_v0 = vpop.f32.mrf.mxu1 }
 0x14f   :  { %v717_v1 = vadd.f32 %v716_v0, %v703_v61 }
 0x151   :  { %v783_v4 = vmul.f32 %v775_v62, %v717_v1 }
 0x153   :  { %v797_v6 = vadd.f32 %v789_v2, %v783_v4  ;;  %v677_v7 = vpop.f32.mrf.mxu2 }
 0x154   :  { %v690_v9 = vpop.f32.mrf.mxu3 }
 0x155   :  { %v801_v11 = vmax.f32 %v797_v6, 0.0  ;;  %v691_v12 = vadd.f32 %v690_v9, %v677_v7  ;;  %v705_v14 = vpop.f32.mrf.mxu0 }
 0x156   :  { %v718_v15 = vpop.f32.mrf.mxu1 }
 0x157   :  { %v1760_v16 = vcvt.f32.s32 %v801_v11  ;;  %v782_v17 = vmul.f32 %v774_v8, %v691_v12  ;;  %v1758_v20 = vand.u32 2147483647, %v801_v11  ;;  %v1763_v22 = vand.u32 2147483648, %v801_v11 }
 0x159   :  { %v1761_v18 = vcvt.s32.f32 %v1760_v16  ;;  %v796_v19 = vadd.f32 %v788_v13, %v782_v17  ;;  %vm1759_vm3 = vcmp.lt.f32.partialorder %v1758_v20, 8388608.0 }
 0x15b   :  { %v1762_v21 = vand.u32 2147483647, %v1761_v18  ;;  %v800_v23 = vmax.f32 %v796_v19, 0.0  ;;  %v679_v24 = vpop.f32.mrf.mxu2 }
 0x15c   :  { %v692_v26 = vpop.f32.mrf.mxu3  ;;  %v1796_v24 = vld [vmem:[%s2118_s10] ss:$0 sm:$0xff] }
 0x15d   :  { %v1752_v27 = vcvt.f32.s32 %v800_v23  ;;  %v755_v28 = vpop.f32.mrf.mxu0  ;;  %v1764_v29 = vor.u32 %v1763_v22, %v1762_v21  ;;  %v1750_v36 = vand.u32 2147483647, %v800_v23  ;;  %v1755_v38 = vand.u32 2147483648, %v800_v23  ;;  %v1795_v21 = vld [vmem:[%s2117_s9] ss:$0 sm:$0xff] }
 0x15e   :  { %v768_v30 = vpop.f32.mrf.mxu1 }
 0x15f   :  { %v1753_v31 = vcvt.s32.f32 %v1752_v27  ;;  %v769_v32 = vadd.f32 %v768_v30, %v755_v28  ;;  %v1765_v34 = vsel %vm1759_vm3, %v1764_v29, %v801_v11  ;;  %vm1751_vm4 = vcmp.lt.f32.partialorder %v1750_v36, 8388608.0 }
 0x160   :  { %v1483_v35 = vclamps-f32 %v1765_v34, 127.0 }
 0x161   :  { %v1754_v37 = vand.u32 2147483647, %v1753_v31  ;;  %v785_v39 = vmul.f32 %v777_v25, %v769_v32 }
 0x162   :  { %v817_v40 = vpack.c.bf16 %v1483_v35, %v1483_v35 }
 0x163   :  { %v799_v41 = vadd.f32 %v791_v33, %v785_v39  ;;  %v729_v42 = vpop.f32.mrf.mxu2  ;;  %v1756_v44 = vor.u32 %v1755_v38, %v1754_v37 }
 0x164   :  { %v742_v45 = vpop.f32.mrf.mxu3  ;;  %1097 = vmatmul.bf16.vlgmr.msra.gmra.mxu3 %v817_v40 }
 0x165   :  { %v803_v46 = vmax.f32 %v799_v41, 0.0  ;;  %v743_v47 = vadd.f32 %v742_v45, %v729_v42  ;;  %v757_v49 = vpop.f32.mrf.mxu0  ;;  %v1757_v50 = vsel %vm1751_vm4, %v1756_v44, %v800_v23 }
 0x166   :  { %v770_v51 = vpop.f32.mrf.mxu1  ;;  %v1482_v52 = vclamps-f32 %v1757_v50, 127.0 }
 0x167   :  { %v1776_v53 = vcvt.f32.s32 %v803_v46  ;;  %v784_v54 = vmul.f32 %v776_v43, %v743_v47  ;;  %v1774_v59 = vand.u32 2147483647, %v803_v46  ;;  %v1779_v61 = vand.u32 2147483648, %v803_v46 }
 0x168   :  { %v816_v55 = vpack.c.bf16 %v1482_v52, %v1482_v52 }
 0x169   :  { %v1777_v56 = vcvt.s32.f32 %v1776_v53  ;;  %v798_v57 = vadd.f32 %v790_v48, %v784_v54  ;;  %vm1775_vm5 = vcmp.lt.f32.partialorder %v1774_v59, 8388608.0 }
 0x16a   :  { %1084 = vmatmul.bf16.vlgmr.msra.gmra.mxu2 %v816_v55 }
 0x16b   :  { %v1778_v58 = vand.u32 2147483647, %v1777_v56  ;;  %v802_v62 = vmax.f32 %v798_v57, 0.0  ;;  %v731_v63 = vpop.f32.mrf.mxu2 }
 0x16c   :  { %v744_v0 = vpop.f32.mrf.mxu3 }
 0x16d   :  { %v1768_v1 = vcvt.f32.s32 %v802_v62  ;;  %v1780_v2 = vor.u32 %v1779_v61, %v1778_v58  ;;  %v1766_v5 = vand.u32 2147483647, %v802_v62  ;;  %v1771_v7 = vand.u32 2147483648, %v802_v62 }
 0x16f   :  { %v1769_v60 = vcvt.s32.f32 %v1768_v1  ;;  %v1781_v3 = vsel %vm1775_vm5, %v1780_v2, %v803_v46  ;;  %vm1767_vm6 = vcmp.lt.f32.partialorder %v1766_v5, 8388608.0 }
 0x170   :  { %v1485_v4 = vclamps-f32 %v1781_v3, 127.0 }
 0x171   :  { %v1770_v6 = vand.u32 2147483647, %v1769_v60 }
 0x172   :  { %v819_v8 = vpack.c.bf16 %v1485_v4, %v1485_v4 }
 0x173   :  { %v1772_v9 = vor.u32 %v1771_v7, %v1770_v6 }
 0x174   :  { %1123 = vmatmul.bf16.vlgmr.msrb.gmra.mxu1 %v819_v8 }
 0x175   :  { %v1773_v10 = vsel %vm1767_vm6, %v1772_v9, %v802_v62 }
 0x176   :  { %v1484_v11 = vclamps-f32 %v1773_v10, 127.0 }
 0x178   :  { %v818_v12 = vpack.c.bf16 %v1484_v11, %v1484_v11 }
 0x17a   :  { %1110 = vmatmul.bf16.vlgmr.msrb.gmra.mxu0 %v818_v12 }
 0x1e7   :  { %v1098_v13 = vpop.f32.mrf.mxu3 }
 0x1ed   :  { %v1085_v14 = vpop.f32.mrf.mxu2 }
 0x1ee   :  { %v1099_v18 = vadd.f32 %v1098_v13, %v1085_v14 }
 0x1ef   :  { %v1100_v15 = vpop.f32.mrf.mxu3 }
 0x1f1   :  { %v1124_v16 = vpop.f32.mrf.mxu1 }
 0x1f5   :  { %v1087_v17 = vpop.f32.mrf.mxu2 }
 0x1f7   :  { %v1111_v19 = vpop.f32.mrf.mxu0 }
 0x1f8   :  { %v1112_v20 = vadd.f32 %v1111_v19, %v1099_v18 }
 0x1f9   :  { %v1126_v22 = vpop.f32.mrf.mxu1 }
 0x1fa   :  { %v1125_v23 = vadd.f32 %v1124_v16, %v1112_v20 }
 0x1fc   :  { %v1132_v26 = vmul.f32 %v1795_v21, %v1125_v23 }
 0x1fe   :  { %v1137_v27 = vadd.f32 %v1796_v24, %v1132_v26 }
 0x1ff   :  { %v1113_v28 = vpop.f32.mrf.mxu0 }
 0x200   :  { %1138 = vst [vmem:[#allocation14] sm:$0xff] %v1137_v27 }
 0x201   :  { %1149 = dma.vmem_to_hbm [thread:$0]  %s1145_s16, 128, %s1147_s18, [#allocation5]  }
 0x202   :  { %1973 = dma.done.wait [#allocation5], 128  }
 0x203   :  { %1974 = vsyncadd [#allocation5], 4294967168 }
 0x204   :  { %1154 = vsyncpa [#allocation4], 1 }
 0x205   :  { %1155 = vsyncpa [#allocation7], 1 }
 0x206   :  { %1156 = vsyncpa [#allocation10], 1 }
 0x207   :  { %1157 = vsyncpa [#allocation13], 1 }
 0x208   :  { %1158 = vsyncpa [#allocation5], 1 }

</bundles_post_ra>
